<compile_context>
chip_gen: v6e
topology: v6e:2x2x1
jax: 0.10.0
libtpu: 0.0.40
codegen_flags: <defaults>
</compile_context>

<pallas_src>
import jax
import jax.numpy as jnp
from jax import lax
from jax.experimental import pallas as pl
from jax.experimental.pallas import tpu as pltpu


def _make_semckd_kernel(num_stu, C, N, temp):
    inv_t = 1.0 / float(temp)
    t2 = float(temp) * float(temp)
    inv_nc = 1.0 / float(N * C)
    eps_sq = 1e-24  # (F.normalize eps = 1e-12) squared, for the rsqrt form

    def kernel(t_ref, *rest):
        s_refs = rest[:num_stu]
        out_ref = rest[num_stu]
        tb = t_ref.shape[0]

        # Lane-axis (N) sums on the otherwise-idle MXU: (R, N) @ (N, 1) -> (R, 1).
        ones_n = jnp.ones((N, 1), jnp.float32)

        def lane_sum(rows):
            return jnp.dot(rows, ones_n, preferred_element_type=jnp.float32)

        # ---------------- teacher-side work: once per batch tile ----------------
        t = t_ref[...].astype(jnp.float32)                          # (TB, C, N)
        t_shift = t * inv_t
        t_shift = t_shift - jnp.max(t_shift, axis=1, keepdims=True)  # shifted logits, once
        t_exp = jnp.exp(t_shift)
        t_den = jnp.sum(t_exp, axis=1, keepdims=True)               # (TB, 1, N)
        p_t = t_exp * (1.0 / t_den)                                 # (TB, C, N), persists
        # sum_c p_t*log_pt = sum_c(p_t * t_shift) - log(t_den)   (since sum_c p_t == 1)
        kd_t_rows = jnp.sum(p_t * t_shift, axis=1) - jnp.log(t_den)[:, 0, :]   # (TB, N), persists
        t_sumsq = lane_sum(jnp.sum(t * t, axis=1))                  # (TB, 1)
        t_n = t * lax.rsqrt(jnp.maximum(t_sumsq, eps_sq))[:, :, None]  # (TB, C, N), persists

        # ---------------- per-student losses (teacher work reused) --------------
        for i in range(num_stu):
            s = s_refs[i][...].astype(jnp.float32)                  # (TB, C, N)

            # DistillKL over the channel axis, collapsed with sum_c p_t == 1:
            #   kd_rows = kd_t_rows - sum_c(p_t * s_shift) + log(s_den)   per lane column.
            s_shift = s * inv_t
            s_shift = s_shift - jnp.max(s_shift, axis=1, keepdims=True)
            s_den = jnp.sum(jnp.exp(s_shift), axis=1, keepdims=True)            # (TB, 1, N)
            kd_rows = (kd_t_rows - jnp.sum(p_t * s_shift, axis=1)
                       + jnp.log(s_den)[:, 0, :])                   # (TB, N)
            s_sq_rows = jnp.sum(s * s, axis=1)                      # (TB, N)

            # One MXU dot covers both of this student's lane sums.
            sums = lane_sum(jnp.concatenate([kd_rows, s_sq_rows], axis=0))      # (2*TB, 1)
            kd = sums[:tb] * (t2 * inv_nc)                          # (TB, 1)

            # FTLoss: per-sample L2 normalize (rsqrt on the EUP), L1, mean over N*C.
            s_n = s * lax.rsqrt(jnp.maximum(sums[tb:], eps_sq))[:, :, None]
            ft = lane_sum(jnp.sum(jnp.abs(s_n - t_n), axis=1)) * inv_nc         # (TB, 1)

            # Single store per student: a (TB, 1, 2) block of the (TB, S, 2) output tile.
            out_ref[:, i:i + 1, :] = jnp.concatenate([kd, ft], axis=-1)[:, None, :]

    return kernel


def _vmem_capacity_bytes():
    """Per-TensorCore VMEM capacity; conservative 64 MiB (v7x-class) fallback."""
    try:
        cap = int(getattr(pltpu.get_tpu_info(), "vmem_capacity_bytes", 0))
        if cap > 0:
            return cap
    except Exception:
        pass
    return 64 * 1024 * 1024


def _vmem_policy():
    """(vmem_limit_bytes, per-step tile budget) tuned per VMEM generation."""
    cap = _vmem_capacity_bytes()
    if cap <= 64 * 1024 * 1024:
        # v7x-class (64 MiB per TC): leave headroom for double buffers + temporaries.
        limit = min(40 * 1024 * 1024, (cap * 5) // 8)
    else:
        # v5e / v6e-class (128 MiB): big tiles amortize per-step overhead & lengthen DMAs.
        limit = min(96 * 1024 * 1024, (cap * 3) // 4)
    return limit, limit // 2


def _pick_batch_tile(B, S, C, N, in_itemsize, budget_bytes):
    """Largest batch tile whose per-step working set fits the budget, capped so a v7x
    megacore gets >= 2 grid steps per TensorCore (keeps the prologue DMA overlapped)."""
    # (S+1) pipelined inputs x 2 buffers + ~8 live f32 tile temporaries (p_t / t_n persist
    # across the unrolled student loop, plus per-student transients).
    per_row = (S + 1) * 2 * C * N * in_itemsize + 8 * C * N * 4
    tb = max(1, int(budget_bytes // max(per_row, 1)))
    tb = min(tb, B)
    if B >= 4:
        tb = min(tb, B // 4)    # >= 4 grid steps => >= 2 per TC under megacore
    elif B >= 2:
        tb = min(tb, B // 2)
    tb = max(tb, 1)
    while B % tb != 0:
        tb -= 1
    return tb


def semckd_loss(s_value, f_target, weight, *, temp=4.0, alpha=0.5):
    """s_value: list of (B, C, H, W); f_target: (B, C, H, W); weight: (B, S).

    Feeding bf16 features is the main lever on bandwidth-bound v5e: the kernel up-casts to
    f32 internally, so halving the input dtype halves HBM traffic with no other change.
    """
    B, C, H, W = f_target.shape
    S = len(s_value)
    N = H * W

    # Free reshapes only (no transpose / stack / cast): NCHW -> (B, C, H*W).  H*W sits on the
    # lane axis; if H*W is far from a multiple of 128 (e.g. 7x7 late-stage maps), lane padding
    # inflates per-element VPU/EUP cost -- consider folding a spatial factor so the lane dim is
    # 128-aligned before calling this wrapper.
    s_bcn = [jnp.reshape(x, (B, C, N)) for x in s_value]
    t_bcn = jnp.reshape(f_target, (B, C, N))

    vmem_limit, budget = _vmem_policy()
    itemsize = jnp.dtype(f_target.dtype).itemsize
    tb = _pick_batch_tile(B, S, C, N, itemsize, budget)

    feat_spec = pl.BlockSpec((tb, C, N), lambda b: (b, 0, 0))
    out = pl.pallas_call(
        _make_semckd_kernel(S, C, N, float(temp)),
        grid=(B // tb,),
        in_specs=[feat_spec] * (S + 1),
        out_specs=pl.BlockSpec((tb, S, 2), lambda b: (b, 0, 0)),
        out_shape=jax.ShapeDtypeStruct((B, S, 2), jnp.float32),
        compiler_params=pltpu.CompilerParams(
            dimension_semantics=("parallel",),
            vmem_limit_bytes=vmem_limit,
        ),
    )(t_bcn, *s_bcn)

    w = weight.astype(jnp.float32)
    ind_kd = out[:, :, 0]   # (B, S)
    ind_fl = out[:, :, 1]   # (B, S)
    return jnp.sum(w * ind_kd) + jnp.float32(alpha) * jnp.sum(w * ind_fl)


def semckd_loss_ref(s_value, f_target, weight, *, temp=4.0, alpha=0.5):
    """Pure-JAX reference mirroring the PyTorch semantics (for verification)."""
    B = f_target.shape[0]

    def kd_elem(s, t):
        ls = jax.nn.log_softmax(s / temp, axis=1)
        lt = jax.nn.log_softmax(t / temp, axis=1)
        return jnp.exp(lt) * (lt - ls) * (temp * temp)

    def ft_elem(s, t):
        sf = s.reshape(B, -1)
        tf = t.reshape(B, -1)
        sn = sf / jnp.maximum(jnp.linalg.norm(sf, axis=1, keepdims=True), 1e-12)
        tn = tf / jnp.maximum(jnp.linalg.norm(tf, axis=1, keepdims=True), 1e-12)
        return jnp.abs(sn - tn)

    ind_kd = jnp.stack(
        [kd_elem(s, f_target).reshape(B, -1).mean(-1) for s in s_value], axis=1)
    ind_fl = jnp.stack(
        [ft_elem(s, f_target).reshape(B, -1).mean(-1) for s in s_value], axis=1)
    return jnp.sum(weight * ind_kd) + alpha * jnp.sum(weight * ind_fl)


if __name__ == "__main__":
    # Small, deterministic shapes consistent with the module's forward.
    B, C, H, W = 2, 16, 8, 8     # batch, channels, spatial
    S = 3                        # num_stu (number of student layers)
    temp, alpha = 4.0, 0.5

    key = jax.random.PRNGKey(0)
    ks = jax.random.split(key, S + 2)
    s_value = [jax.random.normal(ks[i], (B, C, H, W), dtype=jnp.float32) for i in range(S)]
    f_target = jax.random.normal(ks[S], (B, C, H, W), dtype=jnp.float32)
    # SemCKD's attention weights are a per-sample softmax over students.
    weight = jax.nn.softmax(jax.random.normal(ks[S + 1], (B, S), dtype=jnp.float32), axis=-1)

    loss = semckd_loss(s_value, f_target, weight, temp=temp, alpha=alpha)
    loss = jax.block_until_ready(loss)

    loss_ref = semckd_loss_ref(s_value, f_target, weight, temp=temp, alpha=alpha)
    assert jnp.allclose(loss, loss_ref, rtol=1e-4, atol=1e-6), (loss, loss_ref)

    print("KERNEL_OK")
</pallas_src>

<mosaic_0001>
module attributes {stable_mosaic.version = 11 : i64} {
  func.func @kernel(%arg0: i32, %arg1: memref<1x16x64xf32, #tpu.memory_space<vmem>>, %arg2: memref<1x16x64xf32, #tpu.memory_space<vmem>>, %arg3: memref<1x16x64xf32, #tpu.memory_space<vmem>>, %arg4: memref<1x16x64xf32, #tpu.memory_space<vmem>>, %arg5: memref<1x3x2xf32, #tpu.memory_space<vmem>>) attributes {dimension_semantics = [#tpu.dimension_semantics<parallel>], iteration_bounds = array<i64: 2>, scalar_prefetch = 0 : i64, scratch_operands = 0 : i64, tpu.core_type = #tpu.core_type<tc>, window_params = [{transform_indices = @transform_0, window_bounds = array<i64: 1, 16, 64>}, {transform_indices = @transform_1, window_bounds = array<i64: 1, 16, 64>}, {transform_indices = @transform_2, window_bounds = array<i64: 1, 16, 64>}, {transform_indices = @transform_3, window_bounds = array<i64: 1, 16, 64>}, {transform_indices = @transform_4, window_bounds = array<i64: 1, 3, 2>}]} {
    %cst = arith.constant 1.000000e+00 : f32
    %0 = vector.broadcast %cst : f32 to vector<64x1xf32>
    %c0 = arith.constant 0 : index
    %c0_0 = arith.constant 0 : index
    %c0_1 = arith.constant 0 : index
    %1 = vector.load %arg1[%c0, %c0_0, %c0_1] : memref<1x16x64xf32, #tpu.memory_space<vmem>>, vector<1x16x64xf32>
    %cst_2 = arith.constant 2.500000e-01 : f32
    %2 = vector.broadcast %cst_2 : f32 to vector<1x16x64xf32>
    %3 = arith.mulf %1, %2 : vector<1x16x64xf32>
    %cst_3 = arith.constant dense<0xFF800000> : vector<1x64xf32>
    %4 = vector.multi_reduction <maximumf>, %3, %cst_3 [1] : vector<1x16x64xf32> to vector<1x64xf32>
    %5 = vector.shape_cast %4 : vector<1x64xf32> to vector<1x1x64xf32>
    %6 = vector.broadcast %5 : vector<1x1x64xf32> to vector<1x16x64xf32>
    %7 = arith.subf %3, %6 : vector<1x16x64xf32>
    %8 = math.exp %7 : vector<1x16x64xf32>
    %cst_4 = arith.constant dense<0.000000e+00> : vector<1x64xf32>
    %9 = vector.multi_reduction <add>, %8, %cst_4 [1] : vector<1x16x64xf32> to vector<1x64xf32>
    %10 = vector.shape_cast %9 : vector<1x64xf32> to vector<1x1x64xf32>
    %cst_5 = arith.constant 1.000000e+00 : f32
    %11 = vector.broadcast %cst_5 : f32 to vector<1x1x64xf32>
    %12 = arith.divf %11, %10 : vector<1x1x64xf32>
    %13 = vector.broadcast %12 : vector<1x1x64xf32> to vector<1x16x64xf32>
    %14 = arith.mulf %8, %13 : vector<1x16x64xf32>
    %15 = arith.mulf %14, %7 : vector<1x16x64xf32>
    %cst_6 = arith.constant dense<0.000000e+00> : vector<1x64xf32>
    %16 = vector.multi_reduction <add>, %15, %cst_6 [1] : vector<1x16x64xf32> to vector<1x64xf32>
    %17 = math.log %10 : vector<1x1x64xf32>
    %18 = vector.shape_cast %17 : vector<1x1x64xf32> to vector<1x64xf32>
    %19 = arith.subf %16, %18 : vector<1x64xf32>
    %20 = arith.mulf %1, %1 : vector<1x16x64xf32>
    %cst_7 = arith.constant dense<0.000000e+00> : vector<1x64xf32>
    %21 = vector.multi_reduction <add>, %20, %cst_7 [1] : vector<1x16x64xf32> to vector<1x64xf32>
    %cst_8 = arith.constant dense<0.000000e+00> : vector<1x1xf32>
    %22 = tpu.matmul %21, %0, %cst_8 {dimension_numbers = #tpu.dot_dimension_numbers<[1], [0], [0], [1], [0, 0, 1, 1], [], []>} : vector<1x64xf32>, vector<64x1xf32>, vector<1x1xf32> -> vector<1x1xf32>
    %cst_9 = arith.constant 1.000000e-24 : f32
    %23 = vector.broadcast %cst_9 : f32 to vector<1x1xf32>
    %24 = arith.maximumf %22, %23 : vector<1x1xf32>
    %25 = math.rsqrt %24 : vector<1x1xf32>
    %26 = vector.shape_cast %25 : vector<1x1xf32> to vector<1x1x1xf32>
    %27 = vector.broadcast %26 : vector<1x1x1xf32> to vector<1x16x64xf32>
    %28 = arith.mulf %1, %27 : vector<1x16x64xf32>
    %c0_10 = arith.constant 0 : index
    %c0_11 = arith.constant 0 : index
    %c0_12 = arith.constant 0 : index
    %29 = vector.load %arg2[%c0_10, %c0_11, %c0_12] : memref<1x16x64xf32, #tpu.memory_space<vmem>>, vector<1x16x64xf32>
    %cst_13 = arith.constant 2.500000e-01 : f32
    %30 = vector.broadcast %cst_13 : f32 to vector<1x16x64xf32>
    %31 = arith.mulf %29, %30 : vector<1x16x64xf32>
    %cst_14 = arith.constant dense<0xFF800000> : vector<1x64xf32>
    %32 = vector.multi_reduction <maximumf>, %31, %cst_14 [1] : vector<1x16x64xf32> to vector<1x64xf32>
    %33 = vector.shape_cast %32 : vector<1x64xf32> to vector<1x1x64xf32>
    %34 = vector.broadcast %33 : vector<1x1x64xf32> to vector<1x16x64xf32>
    %35 = arith.subf %31, %34 : vector<1x16x64xf32>
    %36 = math.exp %35 : vector<1x16x64xf32>
    %cst_15 = arith.constant dense<0.000000e+00> : vector<1x64xf32>
    %37 = vector.multi_reduction <add>, %36, %cst_15 [1] : vector<1x16x64xf32> to vector<1x64xf32>
    %38 = vector.shape_cast %37 : vector<1x64xf32> to vector<1x1x64xf32>
    %39 = arith.mulf %14, %35 : vector<1x16x64xf32>
    %cst_16 = arith.constant dense<0.000000e+00> : vector<1x64xf32>
    %40 = vector.multi_reduction <add>, %39, %cst_16 [1] : vector<1x16x64xf32> to vector<1x64xf32>
    %41 = arith.subf %19, %40 : vector<1x64xf32>
    %42 = math.log %38 : vector<1x1x64xf32>
    %43 = vector.shape_cast %42 : vector<1x1x64xf32> to vector<1x64xf32>
    %44 = arith.addf %41, %43 : vector<1x64xf32>
    %45 = arith.mulf %29, %29 : vector<1x16x64xf32>
    %cst_17 = arith.constant dense<0.000000e+00> : vector<1x64xf32>
    %46 = vector.multi_reduction <add>, %45, %cst_17 [1] : vector<1x16x64xf32> to vector<1x64xf32>
    %47 = tpu.concatenate %44, %46 in 0 : vector<1x64xf32>, vector<1x64xf32> -> vector<2x64xf32>
    %cst_18 = arith.constant dense<0.000000e+00> : vector<2x1xf32>
    %48 = tpu.matmul %47, %0, %cst_18 {dimension_numbers = #tpu.dot_dimension_numbers<[1], [0], [0], [1], [0, 0, 1, 1], [], []>} : vector<2x64xf32>, vector<64x1xf32>, vector<2x1xf32> -> vector<2x1xf32>
    %49 = vector.extract_strided_slice %48 {offsets = [0, 0], sizes = [1, 1], strides = [1, 1]} : vector<2x1xf32> to vector<1x1xf32>
    %cst_19 = arith.constant 1.562500e-02 : f32
    %50 = vector.broadcast %cst_19 : f32 to vector<1x1xf32>
    %51 = arith.mulf %49, %50 : vector<1x1xf32>
    %52 = vector.extract_strided_slice %48 {offsets = [1, 0], sizes = [1, 1], strides = [1, 1]} : vector<2x1xf32> to vector<1x1xf32>
    %cst_20 = arith.constant 1.000000e-24 : f32
    %53 = vector.broadcast %cst_20 : f32 to vector<1x1xf32>
    %54 = arith.maximumf %52, %53 : vector<1x1xf32>
    %55 = math.rsqrt %54 : vector<1x1xf32>
    %56 = vector.shape_cast %55 : vector<1x1xf32> to vector<1x1x1xf32>
    %57 = vector.broadcast %56 : vector<1x1x1xf32> to vector<1x16x64xf32>
    %58 = arith.mulf %29, %57 : vector<1x16x64xf32>
    %59 = arith.subf %58, %28 : vector<1x16x64xf32>
    %60 = math.absf %59 : vector<1x16x64xf32>
    %cst_21 = arith.constant dense<0.000000e+00> : vector<1x64xf32>
    %61 = vector.multi_reduction <add>, %60, %cst_21 [1] : vector<1x16x64xf32> to vector<1x64xf32>
    %cst_22 = arith.constant dense<0.000000e+00> : vector<1x1xf32>
    %62 = tpu.matmul %61, %0, %cst_22 {dimension_numbers = #tpu.dot_dimension_numbers<[1], [0], [0], [1], [0, 0, 1, 1], [], []>} : vector<1x64xf32>, vector<64x1xf32>, vector<1x1xf32> -> vector<1x1xf32>
    %cst_23 = arith.constant 9.765625E-4 : f32
    %63 = vector.broadcast %cst_23 : f32 to vector<1x1xf32>
    %64 = arith.mulf %62, %63 : vector<1x1xf32>
    %65 = tpu.concatenate %51, %64 in 1 : vector<1x1xf32>, vector<1x1xf32> -> vector<1x2xf32>
    %66 = vector.shape_cast %65 : vector<1x2xf32> to vector<1x1x2xf32>
    %c0_24 = arith.constant 0 : index
    %c0_25 = arith.constant 0 : index
    %c0_26 = arith.constant 0 : index
    %67 = vector.load %arg5[%c0_24, %c0_25, %c0_26] : memref<1x3x2xf32, #tpu.memory_space<vmem>>, vector<1x1x2xf32>
    tpu.vector_store %arg5[%c0_24, %c0_25, %c0_26], %66 {strides = array<i32>} : memref<1x3x2xf32, #tpu.memory_space<vmem>>, vector<1x1x2xf32>,
    %c0_27 = arith.constant 0 : index
    %c0_28 = arith.constant 0 : index
    %c0_29 = arith.constant 0 : index
    %68 = vector.load %arg3[%c0_27, %c0_28, %c0_29] : memref<1x16x64xf32, #tpu.memory_space<vmem>>, vector<1x16x64xf32>
    %cst_30 = arith.constant 2.500000e-01 : f32
    %69 = vector.broadcast %cst_30 : f32 to vector<1x16x64xf32>
    %70 = arith.mulf %68, %69 : vector<1x16x64xf32>
    %cst_31 = arith.constant dense<0xFF800000> : vector<1x64xf32>
    %71 = vector.multi_reduction <maximumf>, %70, %cst_31 [1] : vector<1x16x64xf32> to vector<1x64xf32>
    %72 = vector.shape_cast %71 : vector<1x64xf32> to vector<1x1x64xf32>
    %73 = vector.broadcast %72 : vector<1x1x64xf32> to vector<1x16x64xf32>
    %74 = arith.subf %70, %73 : vector<1x16x64xf32>
    %75 = math.exp %74 : vector<1x16x64xf32>
    %cst_32 = arith.constant dense<0.000000e+00> : vector<1x64xf32>
    %76 = vector.multi_reduction <add>, %75, %cst_32 [1] : vector<1x16x64xf32> to vector<1x64xf32>
    %77 = vector.shape_cast %76 : vector<1x64xf32> to vector<1x1x64xf32>
    %78 = arith.mulf %14, %74 : vector<1x16x64xf32>
    %cst_33 = arith.constant dense<0.000000e+00> : vector<1x64xf32>
    %79 = vector.multi_reduction <add>, %78, %cst_33 [1] : vector<1x16x64xf32> to vector<1x64xf32>
    %80 = arith.subf %19, %79 : vector<1x64xf32>
    %81 = math.log %77 : vector<1x1x64xf32>
    %82 = vector.shape_cast %81 : vector<1x1x64xf32> to vector<1x64xf32>
    %83 = arith.addf %80, %82 : vector<1x64xf32>
    %84 = arith.mulf %68, %68 : vector<1x16x64xf32>
    %cst_34 = arith.constant dense<0.000000e+00> : vector<1x64xf32>
    %85 = vector.multi_reduction <add>, %84, %cst_34 [1] : vector<1x16x64xf32> to vector<1x64xf32>
    %86 = tpu.concatenate %83, %85 in 0 : vector<1x64xf32>, vector<1x64xf32> -> vector<2x64xf32>
    %cst_35 = arith.constant dense<0.000000e+00> : vector<2x1xf32>
    %87 = tpu.matmul %86, %0, %cst_35 {dimension_numbers = #tpu.dot_dimension_numbers<[1], [0], [0], [1], [0, 0, 1, 1], [], []>} : vector<2x64xf32>, vector<64x1xf32>, vector<2x1xf32> -> vector<2x1xf32>
    %88 = vector.extract_strided_slice %87 {offsets = [0, 0], sizes = [1, 1], strides = [1, 1]} : vector<2x1xf32> to vector<1x1xf32>
    %cst_36 = arith.constant 1.562500e-02 : f32
    %89 = vector.broadcast %cst_36 : f32 to vector<1x1xf32>
    %90 = arith.mulf %88, %89 : vector<1x1xf32>
    %91 = vector.extract_strided_slice %87 {offsets = [1, 0], sizes = [1, 1], strides = [1, 1]} : vector<2x1xf32> to vector<1x1xf32>
    %cst_37 = arith.constant 1.000000e-24 : f32
    %92 = vector.broadcast %cst_37 : f32 to vector<1x1xf32>
    %93 = arith.maximumf %91, %92 : vector<1x1xf32>
    %94 = math.rsqrt %93 : vector<1x1xf32>
    %95 = vector.shape_cast %94 : vector<1x1xf32> to vector<1x1x1xf32>
    %96 = vector.broadcast %95 : vector<1x1x1xf32> to vector<1x16x64xf32>
    %97 = arith.mulf %68, %96 : vector<1x16x64xf32>
    %98 = arith.subf %97, %28 : vector<1x16x64xf32>
    %99 = math.absf %98 : vector<1x16x64xf32>
    %cst_38 = arith.constant dense<0.000000e+00> : vector<1x64xf32>
    %100 = vector.multi_reduction <add>, %99, %cst_38 [1] : vector<1x16x64xf32> to vector<1x64xf32>
    %cst_39 = arith.constant dense<0.000000e+00> : vector<1x1xf32>
    %101 = tpu.matmul %100, %0, %cst_39 {dimension_numbers = #tpu.dot_dimension_numbers<[1], [0], [0], [1], [0, 0, 1, 1], [], []>} : vector<1x64xf32>, vector<64x1xf32>, vector<1x1xf32> -> vector<1x1xf32>
    %cst_40 = arith.constant 9.765625E-4 : f32
    %102 = vector.broadcast %cst_40 : f32 to vector<1x1xf32>
    %103 = arith.mulf %101, %102 : vector<1x1xf32>
    %104 = tpu.concatenate %90, %103 in 1 : vector<1x1xf32>, vector<1x1xf32> -> vector<1x2xf32>
    %105 = vector.shape_cast %104 : vector<1x2xf32> to vector<1x1x2xf32>
    %c0_41 = arith.constant 0 : index
    %c1 = arith.constant 1 : index
    %c0_42 = arith.constant 0 : index
    %106 = vector.load %arg5[%c0_41, %c1, %c0_42] : memref<1x3x2xf32, #tpu.memory_space<vmem>>, vector<1x1x2xf32>
    tpu.vector_store %arg5[%c0_41, %c1, %c0_42], %105 {strides = array<i32>} : memref<1x3x2xf32, #tpu.memory_space<vmem>>, vector<1x1x2xf32>,
    %c0_43 = arith.constant 0 : index
    %c0_44 = arith.constant 0 : index
    %c0_45 = arith.constant 0 : index
    %107 = vector.load %arg4[%c0_43, %c0_44, %c0_45] : memref<1x16x64xf32, #tpu.memory_space<vmem>>, vector<1x16x64xf32>
    %cst_46 = arith.constant 2.500000e-01 : f32
    %108 = vector.broadcast %cst_46 : f32 to vector<1x16x64xf32>
    %109 = arith.mulf %107, %108 : vector<1x16x64xf32>
    %cst_47 = arith.constant dense<0xFF800000> : vector<1x64xf32>
    %110 = vector.multi_reduction <maximumf>, %109, %cst_47 [1] : vector<1x16x64xf32> to vector<1x64xf32>
    %111 = vector.shape_cast %110 : vector<1x64xf32> to vector<1x1x64xf32>
    %112 = vector.broadcast %111 : vector<1x1x64xf32> to vector<1x16x64xf32>
    %113 = arith.subf %109, %112 : vector<1x16x64xf32>
    %114 = math.exp %113 : vector<1x16x64xf32>
    %cst_48 = arith.constant dense<0.000000e+00> : vector<1x64xf32>
    %115 = vector.multi_reduction <add>, %114, %cst_48 [1] : vector<1x16x64xf32> to vector<1x64xf32>
    %116 = vector.shape_cast %115 : vector<1x64xf32> to vector<1x1x64xf32>
    %117 = arith.mulf %14, %113 : vector<1x16x64xf32>
    %cst_49 = arith.constant dense<0.000000e+00> : vector<1x64xf32>
    %118 = vector.multi_reduction <add>, %117, %cst_49 [1] : vector<1x16x64xf32> to vector<1x64xf32>
    %119 = arith.subf %19, %118 : vector<1x64xf32>
    %120 = math.log %116 : vector<1x1x64xf32>
    %121 = vector.shape_cast %120 : vector<1x1x64xf32> to vector<1x64xf32>
    %122 = arith.addf %119, %121 : vector<1x64xf32>
    %123 = arith.mulf %107, %107 : vector<1x16x64xf32>
    %cst_50 = arith.constant dense<0.000000e+00> : vector<1x64xf32>
    %124 = vector.multi_reduction <add>, %123, %cst_50 [1] : vector<1x16x64xf32> to vector<1x64xf32>
    %125 = tpu.concatenate %122, %124 in 0 : vector<1x64xf32>, vector<1x64xf32> -> vector<2x64xf32>
    %cst_51 = arith.constant dense<0.000000e+00> : vector<2x1xf32>
    %126 = tpu.matmul %125, %0, %cst_51 {dimension_numbers = #tpu.dot_dimension_numbers<[1], [0], [0], [1], [0, 0, 1, 1], [], []>} : vector<2x64xf32>, vector<64x1xf32>, vector<2x1xf32> -> vector<2x1xf32>
    %127 = vector.extract_strided_slice %126 {offsets = [0, 0], sizes = [1, 1], strides = [1, 1]} : vector<2x1xf32> to vector<1x1xf32>
    %cst_52 = arith.constant 1.562500e-02 : f32
    %128 = vector.broadcast %cst_52 : f32 to vector<1x1xf32>
    %129 = arith.mulf %127, %128 : vector<1x1xf32>
    %130 = vector.extract_strided_slice %126 {offsets = [1, 0], sizes = [1, 1], strides = [1, 1]} : vector<2x1xf32> to vector<1x1xf32>
    %cst_53 = arith.constant 1.000000e-24 : f32
    %131 = vector.broadcast %cst_53 : f32 to vector<1x1xf32>
    %132 = arith.maximumf %130, %131 : vector<1x1xf32>
    %133 = math.rsqrt %132 : vector<1x1xf32>
    %134 = vector.shape_cast %133 : vector<1x1xf32> to vector<1x1x1xf32>
    %135 = vector.broadcast %134 : vector<1x1x1xf32> to vector<1x16x64xf32>
    %136 = arith.mulf %107, %135 : vector<1x16x64xf32>
    %137 = arith.subf %136, %28 : vector<1x16x64xf32>
    %138 = math.absf %137 : vector<1x16x64xf32>
    %cst_54 = arith.constant dense<0.000000e+00> : vector<1x64xf32>
    %139 = vector.multi_reduction <add>, %138, %cst_54 [1] : vector<1x16x64xf32> to vector<1x64xf32>
    %cst_55 = arith.constant dense<0.000000e+00> : vector<1x1xf32>
    %140 = tpu.matmul %139, %0, %cst_55 {dimension_numbers = #tpu.dot_dimension_numbers<[1], [0], [0], [1], [0, 0, 1, 1], [], []>} : vector<1x64xf32>, vector<64x1xf32>, vector<1x1xf32> -> vector<1x1xf32>
    %cst_56 = arith.constant 9.765625E-4 : f32
    %141 = vector.broadcast %cst_56 : f32 to vector<1x1xf32>
    %142 = arith.mulf %140, %141 : vector<1x1xf32>
    %143 = tpu.concatenate %129, %142 in 1 : vector<1x1xf32>, vector<1x1xf32> -> vector<1x2xf32>
    %144 = vector.shape_cast %143 : vector<1x2xf32> to vector<1x1x2xf32>
    %c0_57 = arith.constant 0 : index
    %c2 = arith.constant 2 : index
    %c0_58 = arith.constant 0 : index
    %145 = vector.load %arg5[%c0_57, %c2, %c0_58] : memref<1x3x2xf32, #tpu.memory_space<vmem>>, vector<1x1x2xf32>
    tpu.vector_store %arg5[%c0_57, %c2, %c0_58], %144 {strides = array<i32>} : memref<1x3x2xf32, #tpu.memory_space<vmem>>, vector<1x1x2xf32>,
    return
  }
  func.func @transform_0(%arg0: i32) -> (i32, i32, i32) {
    %c0_i32 = arith.constant 0 : i32
    %c0_i32_0 = arith.constant 0 : i32
    %c0_i32_1 = arith.constant 0 : i32
    return %arg0, %c0_i32, %c0_i32_0 : i32, i32, i32
  }
  func.func @transform_1(%arg0: i32) -> (i32, i32, i32) {
    %c0_i32 = arith.constant 0 : i32
    %c0_i32_0 = arith.constant 0 : i32
    %c0_i32_1 = arith.constant 0 : i32
    return %arg0, %c0_i32, %c0_i32_0 : i32, i32, i32
  }
  func.func @transform_2(%arg0: i32) -> (i32, i32, i32) {
    %c0_i32 = arith.constant 0 : i32
    %c0_i32_0 = arith.constant 0 : i32
    %c0_i32_1 = arith.constant 0 : i32
    return %arg0, %c0_i32, %c0_i32_0 : i32, i32, i32
  }
  func.func @transform_3(%arg0: i32) -> (i32, i32, i32) {
    %c0_i32 = arith.constant 0 : i32
    %c0_i32_0 = arith.constant 0 : i32
    %c0_i32_1 = arith.constant 0 : i32
    return %arg0, %c0_i32, %c0_i32_0 : i32, i32, i32
  }
  func.func @transform_4(%arg0: i32) -> (i32, i32, i32) {
    %c0_i32 = arith.constant 0 : i32
    %c0_i32_0 = arith.constant 0 : i32
    %c0_i32_1 = arith.constant 0 : i32
    return %arg0, %c0_i32, %c0_i32_0 : i32, i32, i32
  }
}

</mosaic_0001>

<bundles_post_ra>
// kernel: tpu_custom_call.1
= control target key start
LH: loop header
LB: loop body
LE: loop exit
PB: predicated region body
PF: predicated region fallthrough
CT: control target
= control target key end

     0   :  { %s2375_s0 = inlined_call_operand.hbm [shape: f32[2,16,64], index: 0, kind: input, shape index: {}]   ;;  %s2376_s1 = inlined_call_operand.hbm [shape: f32[2,16,64], index: 1, kind: input, shape index: {}]   ;;  %s2377_s2 = inlined_call_operand.hbm [shape: f32[2,16,64], index: 2, kind: input, shape index: {}]   ;;  %s2378_s3 = inlined_call_operand.hbm [shape: f32[2,16,64], index: 3, kind: input, shape index: {}]   ;;  %s2379_s4 = inlined_call_operand.vmem [shape: f32[2,3,2], index: 4, kind: output, shape index: {}]  }
   0x1   :  { %2385 = sst [smem:[#allocation12_spill]] %s2375_s0 }
   0x2   :  { %9 = vsyncpa [#allocation3], 0 }
   0x3   :  { %11 = vsyncpa [#allocation3 + $0x1], 0 }
   0x4   :  { %12 = vsyncpa [#allocation5], 0 }
   0x5   :  { %14 = vsyncpa [#allocation5 + $0x1], 0 }
   0x6   :  { %15 = vsyncpa [#allocation8], 0 }
   0x7   :  { %17 = vsyncpa [#allocation8 + $0x1], 0  ;;  %s1822_s15 = smov 0   ;;  %s1824_s16 = smov 0  }
   0x8   :  { %s1826_s17 = smov 0   ;;  %s1828_s18 = smov 0  }
   0x9 LB: > { %s1841_s19 = sadd.s32 4294967295, %s1785_s18   ;;  %s1844_s20 = sadd.s32 1, %s1785_s18   ;;  %s1785_s18 = sphi %s1828_s18, %s2400_s18   ;;  %s1781_s17 = sphi %s1826_s17, %s2399_s17   ;;  %s1777_s16 = sphi %s1824_s16, %s2398_s16   ;;  %s1773_s15 = sphi %s1822_s15, %s2397_s15  }
   0xa   : > { %s27_s21 = ssub.s32 %s1785_s18, %s1844_s20  ;;  %s30_s22 = sadd.s32 1, %s1781_s17 }
   0xb   : > { %p28_p0 = scmp.eq.s32.totalorder %s27_s21, 0  ;;  %p37_p1 = scmp.ne.s32.totalorder %s1781_s17, %s1777_s16 }
   0xc   : > { %p38_p2 = scmp.eq.s32.totalorder %s1785_s18, 0  ;;  %p43_p3 = scmp.ne.s32.totalorder %s1777_s16, %s1773_s15 }
   0xd   : > { %s1854_s23 = scalar_select %p28_p0, %s1781_s17, %s30_s22  }
   0xe   : > { %p39_p4 = por %p38_p2, %p37_p1  ;;  %p44_p5 = scmp.eq.s32.totalorder %s1841_s19, 0 }
   0xf   : > { %p1558_p6 = scmp.lt.s32.totalorder %s1785_s18, 2  ;;  %s1863_s25 = sand.u32 1, %s1781_s17  }
  0x10   : > { %p1858_p7 = por %p44_p5, %p43_p3  ;;  %s1866_s26 = sshll.u32 %s1863_s25, 4 }
  0x11   : > { %s1869_s27 = sshll.u32 %s1785_s18, 8  ;;  %p1871_p8 = pnand %p1558_p6, %p39_p4 }
  0x12   : > { %s2386_s24 = scalar_select %p1858_p7, 1, 0 }
  0x13   : > { %s192_s29 = sand.u32 1, %s1785_s18   ;;  %s1880_s6 = scalar_lea.hbm %s2376_s1, %s1869_s27 }
  0x14   : > { %s196_s7 = scalar_lea.vmem [#allocation4], %s1866_s26  ;;  %s1887_s9 = scalar_lea.sflag [#allocation5], %s192_s29 }
  0x15   : > { %s203_s8 = sshll.u32 %s196_s7, 4  ;;  %s1631_s10 = scalar_lea.hbm %s1880_s6, 256  ;;  %s1884_s8 = int_to_ptr.vmem [resolvable:$true] %s203_s8 }
  0x16   : > { %p1632_p11 = scmp.ne.s32.totalorder %s1880_s6, %s1631_s10  ;;  %p1893_p12 = pneg %p1871_p8 }
  0x17   : > { %s1636_s14 = scalar_lea.hbm %s2376_s1, 512  ;;  %p1637_p1 = scmp.lt.s32.totalorder %s1880_s6, %s2376_s1 }
  0x18   : > { %p1634_p13 = pnand %p1893_p12, %p1632_p11  ;;  %p1638_p2 = scmp.lt.s32.totalorder %s1636_s14, %s1631_s10 }
  0x1a   : > { %p1635_p0 = pneg %p1634_p13  ;;  %p1639_p3 = por %p1638_p2, %p1637_p1 }
  0x1c   : > { %p1640_p4 = pnand %p1639_p3, %p1635_p0 }
  0x1e   : > { %1643 = shalt.err (!%p1640_p4)
}
  0x1f   : > { %s1644_s22 = scalar_lea.vmem %s1884_s8, 256  ;;  %s1787_s29 = smov [#allocation4]  }
  0x20   : > { %p1645_p5 = scmp.ne.s32.totalorder %s1884_s8, %s1644_s22  ;;  %s1649_s30 = sshll.u32 %s1787_s29, 4  ;;  %s1650_s30 = int_to_ptr.vmem [resolvable:$false] %s1649_s30 }
  0x21   : > { %s1651_s5 = scalar_lea.vmem %s1650_s30, 512  ;;  %p1652_p13 = scmp.lt.s32.totalorder %s1884_s8, %s1650_s30 }
  0x22   : > { %p1647_p6 = pnand %p1645_p5, %p1893_p12  ;;  %p1653_p9 = scmp.lt.s32.totalorder %s1651_s5, %s1644_s22 }
  0x24   : > { %p1648_p11 = pneg %p1647_p6  ;;  %p1654_p10 = por %p1653_p9, %p1652_p13 }
  0x26   : > { %p1655_p7 = pnand %p1654_p10, %p1648_p11 }
  0x28   : > { %1658 = shalt.err (!%p1655_p7)
}
  0x29   : > { %s2381_s7 = smov 128   ;;  %s2383_s10 = smov 8  }
  0x2a   : > { %1551 = dma.hbm_to_vmem [thread:$0]  (!%p1871_p8), %s1880_s6, 256, %s1884_s8, %s1887_s9, %s2381_s7, %s2381_s7, %s2383_s10  }
  0x2b   : > { %p2389_p9 = scmp.lt.s32.totalorder %s1785_s18, 3  ;;  %p2390_p7 = scmp.ge.s32.totalorder %s1785_s18, 1 }
  0x2c   : > { %s2392_s0 = sld [smem:[#allocation12_spill]]  ;;  %s175_s21 = scalar_lea.vmem [#allocation2], %s1866_s26 }
  0x2d   : > { %p1923_p10 = pnand %p2390_p7, %p2389_p9  ;;  %s182_s22 = sshll.u32 %s175_s21, 4  ;;  %s1934_s22 = int_to_ptr.vmem [resolvable:$true] %s182_s22 }
  0x2e   : > { %s1940_s18 = scalar_lea.hbm %s2377_s2, %s1869_s27  ;;  %s172_s8 = scalar_lea.sflag [#allocation3], %s1863_s25 }
  0x2f   : > { %s2391_s12 = scalar_select %p1923_p10, 1, 0 }
  0x32   : > { %s1931_s15 = scalar_lea.hbm %s2392_s0, %s1869_s27  ;;  %s1664_s14 = scalar_lea.hbm %s2392_s0, 512 }
  0x33   : > { %s1659_s30 = scalar_lea.hbm %s1931_s15, 256  ;;  %p1665_p3 = scmp.lt.s32.totalorder %s1931_s15, %s2392_s0 }
  0x34   : > { %p1660_p0 = scmp.ne.s32.totalorder %s1931_s15, %s1659_s30  ;;  %p1666_p4 = scmp.lt.s32.totalorder %s1664_s14, %s1659_s30 }
  0x36   : > { %p1662_p1 = pnand %p1660_p0, %p1893_p12  ;;  %p1667_p5 = por %p1666_p4, %p1665_p3 }
  0x38   : > { %p1663_p2 = pneg %p1662_p1 }
  0x3a   : > { %p1668_p6 = pnand %p1667_p5, %p1663_p2 }
  0x3c   : > { %1671 = shalt.err (!%p1668_p6)
}
  0x3d   : > { %s1672_s21 = scalar_lea.vmem %s1934_s22, 256  ;;  %s1790_s29 = smov [#allocation2]  }
  0x3e   : > { %p1673_p11 = scmp.ne.s32.totalorder %s1934_s22, %s1672_s21  ;;  %s1677_s6 = sshll.u32 %s1790_s29, 4  ;;  %s1678_s6 = int_to_ptr.vmem [resolvable:$false] %s1677_s6 }
  0x3f   : > { %s1679_s5 = scalar_lea.vmem %s1678_s6, 512  ;;  %p1680_p7 = scmp.lt.s32.totalorder %s1934_s22, %s1678_s6 }
  0x40   : > { %p1675_p13 = pnand %p1673_p11, %p1893_p12  ;;  %p1681_p0 = scmp.lt.s32.totalorder %s1679_s5, %s1672_s21 }
  0x42   : > { %p1676_p9 = pneg %p1675_p13  ;;  %p1682_p1 = por %p1681_p0, %p1680_p7 }
  0x44   : > { %p1683_p10 = pnand %p1682_p1, %p1676_p9 }
  0x46   : > { %1686 = shalt.err (!%p1683_p10)
}
  0x47   : > { %s2393_s7 = smov 8   ;;  %s2394_s10 = smov 128  }
  0x48   : > { %1548 = dma.hbm_to_vmem [thread:$0]  (!%p1871_p8), %s1931_s15, 256, %s1934_s22, %s172_s8, %s2394_s10, %s2394_s10, %s2393_s7  }
  0x49   : > { %s217_s30 = scalar_lea.vmem [#allocation6], %s1866_s26  ;;  %s1687_s14 = scalar_lea.hbm %s1940_s18, 256 }
  0x4a   : > { %s224_s13 = sshll.u32 %s217_s30, 4  ;;  %p1688_p2 = scmp.ne.s32.totalorder %s1940_s18, %s1687_s14  ;;  %s225_s13 = int_to_ptr.vmem [resolvable:$true] %s224_s13 }
  0x4b   : > { %s1692_s6 = scalar_lea.hbm %s2377_s2, 512  ;;  %p1693_p4 = scmp.lt.s32.totalorder %s1940_s18, %s2377_s2 }
  0x4c   : > { %p1690_p10 = pnand %p1688_p2, %p1893_p12  ;;  %p1694_p5 = scmp.lt.s32.totalorder %s1692_s6, %s1687_s14 }
  0x4e   : > { %p1691_p3 = pneg %p1690_p10  ;;  %p1695_p6 = por %p1694_p5, %p1693_p4 }
  0x50   : > { %p1696_p11 = pnand %p1695_p6, %p1691_p3 }
  0x52   : > { %1699 = shalt.err (!%p1696_p11)
}
  0x53   : > { %s1700_s15 = scalar_lea.vmem %s225_s13, 256  ;;  %s1791_s22 = smov [#allocation6]  }
  0x54   : > { %p1701_p13 = scmp.ne.s32.totalorder %s225_s13, %s1700_s15  ;;  %s1705_s8 = sshll.u32 %s1791_s22, 4  ;;  %s1706_s8 = int_to_ptr.vmem [resolvable:$false] %s1705_s8 }
  0x55   : > { %s1707_s30 = scalar_lea.vmem %s1706_s8, 512  ;;  %p1708_p0 = scmp.lt.s32.totalorder %s225_s13, %s1706_s8 }
  0x56   : > { %p1703_p9 = pnand %p1701_p13, %p1893_p12  ;;  %p1709_p1 = scmp.lt.s32.totalorder %s1707_s30, %s1700_s15 }
  0x58   : > { %p1704_p7 = pneg %p1703_p9  ;;  %p1710_p2 = por %p1709_p1, %p1708_p0 }
  0x5a   : > { %p1711_p10 = pnand %p1710_p2, %p1704_p7 }
  0x5c   : > { %1714 = shalt.err (!%p1711_p10)
}
  0x5d   : > { %1554 = dma.hbm_to_vmem [thread:$0]  (!%p1871_p8), %s1940_s18, 256, %s225_s13, %s1887_s9, %s2394_s10, %s2394_s10, %s2393_s7  }
  0x5e   : > { %s1991_s21 = scalar_lea.hbm %s2378_s3, %s1869_s27  ;;  %s238_s29 = scalar_lea.vmem [#allocation7], %s1866_s26 }
  0x5f   : > { %s245_s6 = sshll.u32 %s238_s29, 4  ;;  %s235_s5 = scalar_lea.sflag [#allocation8], %s1863_s25  ;;  %s1994_s6 = int_to_ptr.vmem [resolvable:$true] %s245_s6 }
  0x60   : > { %s1715_s15 = scalar_lea.hbm %s1991_s21, 256  ;;  %s1720_s18 = scalar_lea.hbm %s2378_s3, 512 }
  0x61   : > { %p1716_p3 = scmp.ne.s32.totalorder %s1991_s21, %s1715_s15  ;;  %p1721_p6 = scmp.lt.s32.totalorder %s1991_s21, %s2378_s3 }
  0x62   : > { %p1722_p11 = scmp.lt.s32.totalorder %s1720_s18, %s1715_s15 }
  0x63   : > { %p1718_p4 = pnand %p1716_p3, %p1893_p12 }
  0x64   : > { %p1723_p13 = por %p1722_p11, %p1721_p6 }
  0x65   : > { %p1719_p5 = pneg %p1718_p4 }
  0x67   : > { %p1724_p9 = pnand %p1723_p13, %p1719_p5 }
  0x69   : > { %1727 = shalt.err (!%p1724_p9)
}
  0x6a   : > { %s1728_s25 = scalar_lea.vmem %s1994_s6, 256  ;;  %s1792_s26 = smov [#allocation7]  }
  0x6b   : > { %p1729_p7 = scmp.ne.s32.totalorder %s1994_s6, %s1728_s25  ;;  %s1733_s8 = sshll.u32 %s1792_s26, 4  ;;  %s1734_s8 = int_to_ptr.vmem [resolvable:$false] %s1733_s8 }
  0x6c   : > { %s1735_s30 = scalar_lea.vmem %s1734_s8, 512  ;;  %p1736_p2 = scmp.lt.s32.totalorder %s1994_s6, %s1734_s8 }
  0x6d   : > { %p1731_p0 = pnand %p1729_p7, %p1893_p12  ;;  %p1737_p10 = scmp.lt.s32.totalorder %s1735_s30, %s1728_s25 }
  0x6f   : > { %p1732_p1 = pneg %p1731_p0  ;;  %p1738_p3 = por %p1737_p10, %p1736_p2 }
  0x71   : > { %p1739_p4 = pnand %p1738_p3, %p1732_p1 }
  0x73   : > { %1742 = shalt.err (!%p1739_p4)
}
  0x74   : > { %1557 = dma.hbm_to_vmem [thread:$0]  (!%p1871_p8), %s1991_s21, 256, %s1994_s6, %s235_s5, %s2394_s10, %s2394_s10, %s2393_s7  }
  0x75   : > { %p2395_p12 = scmp.ne.s32.totalorder %s2391_s12, 0 }
  0x76   : > { %s259_s11 = sand.u32 (!%p2395_p12), 1, %s1777_s16   ;;  %p2396_p5 = scmp.ne.s32.totalorder (!%p2395_p12), %s2386_s24, 0 }
  0x77   : > { %257 = sbr.rel (%p2395_p12) target bundleno = 850 (0x352), region = 36  ;;  %s2023_s0 = sshll.u32 (!%p2395_p12), %s259_s11, 4 }
  0x78   : > { %s260_s14 = scalar_lea.sflag (!%p2395_p12), [#allocation3], %s259_s11  ;;  %s263_s29 = scalar_lea.vmem (!%p2395_p12), [#allocation2], %s2023_s0 }
  0x7c   : > { %1760 = dma.done.wait (%p2396_p5), %s260_s14, 256  }
  0x7d   : > { %1762 = vsyncadd (%p2396_p5), %s260_s14, 4294967040  ;;  %s268_s28 = sand.u32 1, %s1841_s19   ;;  %s272_s12 = scalar_lea.vmem [#allocation4], %s2023_s0 }
  0x7e   : > { %s269_s7 = scalar_lea.sflag [#allocation5], %s268_s28 }
  0x7f   : > { %1764 = dma.done.wait (%p2396_p5), %s269_s7, 512  }
  0x80   : > { %1766 = vsyncadd (%p2396_p5), %s269_s7, 4294966784  ;;  %s281_s10 = scalar_lea.vmem [#allocation6], %s2023_s0  ;;  %s287_s21 = scalar_lea.sflag [#allocation8], %s259_s11 }
  0x81   : > { %s290_s6 = scalar_lea.vmem [#allocation7], %s2023_s0 }
  0x82   : > { %1768 = dma.done.wait (%p2396_p5), %s287_s21, 256  }
  0x83   : > { %1770 = vsyncadd (%p2396_p5), %s287_s21, 4294967040  ;;  %v1793_v0 = vmov 0.0   ;;  %v1794_v1 = vmov 1.0   ;;  %v2056_v2 = vld [vmem:[%s263_s29] sm:$0xff]  ;;  %v2058_v3 = vld [vmem:[%s263_s29 + $0x8] sm:$0xff]  ;;  %vm337_vm0 = vcmask 523264  }
  0x84   : > { %1415 = vmatprep.subr.mxu1 %v1793_v0  ;;  %1396 = vmatprep.subr.mxu0 %v1793_v0  ;;  %v2062_v4 = vld [vmem:[%s272_s12] sm:$0xff]  ;;  %v2067_v5 = vmul.f32 0.25, %v2056_v2  ;;  %v2070_v6 = vmul.f32 0.25, %v2058_v3  ;;  %v380_v7 = vmul.f32 %v2056_v2, %v2056_v2  ;;  %v381_v8 = vmul.f32 %v2058_v3, %v2058_v3  ;;  %v2078_v9 = vld [vmem:[%s272_s12 + $0x8] sm:$0xff]  ;;  %s1796_s9 = smov 1   ;;  %p329_p8 = scmp.lt.s32.totalorder %s1841_s19, 1 }
  0x85   : > { %1416 = vmatpush3.msra.mxu1 %v1794_v1  ;;  %1397 = vmatpush3.msra.mxu0 %v1794_v1  ;;  %v2083_v10 = vmul.f32 0.25, %v2062_v4  ;;  %v2086_v11 = vmul.f32 0.25, %v2078_v9  ;;  %v2090_v12 = vld [vmem:[%s281_s10] sm:$0xff]  ;;  %v2102_v17 = vld [vmem:[%s281_s10 + $0x8] sm:$0xff]  ;;  %vm1795_vm1 = vmmov 0   ;;  %vm526_vm2 = vcmask 1040384  }
  0x86   : > { %1417 = vmatprep.subr.mxu1 %v1793_v0  ;;  %1398 = vmatprep.subr.mxu0 %v1793_v0  ;;  %v338_v13 = vsel %vm337_vm0, %v2067_v5, -inf  ;;  %v339_v14 = vsel %vm337_vm0, %v2070_v6, -inf  ;;  %v382_v15 = vsel %vm337_vm0, %v380_v7, 0.0  ;;  %v383_v16 = vsel %vm337_vm0, %v381_v8, 0.0  ;;  %v2130_v32 = vld [vmem:[%s290_s6] sm:$0xff]  ;;  %v2134_v33 = vld [vmem:[%s290_s6 + $0x8] sm:$0xff] }
  0x87   : > { %1418 = vmatpush3.msra.mxu1 %v1794_v1  ;;  %1399 = vmatpush3.msra.mxu0 %v1794_v1  ;;  %v340_v18 = vmax.f32 %v338_v13, %v339_v14  ;;  %v384_v19 = vadd.f32 %v383_v16, %v382_v15  ;;  %v476_v20 = vsel %vm337_vm0, %v2083_v10, -inf  ;;  %v477_v21 = vsel %vm337_vm0, %v2086_v11, -inf  ;;  %s2402_s19 = smov (!%p329_p8, %s1841_s19), 1 }
  0x88   : > { %1419 = vmatprep.subr.mxu1 %v1793_v0  ;;  %1400 = vmatprep.subr.mxu0 %v1793_v0  ;;  %v478_v22 = vmax.f32 %v476_v20, %v477_v21  ;;  %v2113_v23 = vmul.f32 0.25, %v2090_v12  ;;  %v2118_v26 = vmul.f32 0.25, %v2102_v17  ;;  %v2144_v40 = vmul.f32 0.25, %v2130_v32  ;;  %s1319_s18 = sshll.u32 %s2402_s19, 2 }
  0x89   : > { %1420 = vmatpush3.msra.mxu1 %v1794_v1  ;;  %1401 = vmatpush3.msra.mxu0 %v1794_v1  ;;  %v341_v24 = vrot.slane %v340_v18, 4  ;;  %v385_v25 = vrot.slane %v384_v19, 4  ;;  %v2147_v41 = vmul.f32 0.25, %v2134_v33  ;;  %vm702_vm3 = vcmask 7168   ;;  %s332_s25 = scalar_lea.vmem %s2379_s4, %s1319_s18 }
  0x8a   : > { %1421 = vmatprep.subr.mxu1 %v1793_v0  ;;  %1402 = vmatprep.subr.mxu0 %v1793_v0  ;;  %v479_v27 = vrot.slane %v478_v22, 4  ;;  %v710_v28 = vsel %vm337_vm0, %v2113_v23, -inf  ;;  %v711_v31 = vsel %vm337_vm0, %v2118_v26, -inf  ;;  %v941_v46 = vsel %vm337_vm0, %v2144_v40, -inf }
  0x8b   : > { %1422 = vmatpush3.msra.mxu1 %v1794_v1  ;;  %1403 = vmatpush3.msra.mxu0 %v1794_v1  ;;  %v342_v29 = vmax.f32 %v340_v18, %v341_v24  ;;  %v386_v30 = vadd.f32 %v385_v25, %v384_v19  ;;  %v712_v35 = vmax.f32 %v710_v28, %v711_v31  ;;  %v942_v47 = vsel %vm337_vm0, %v2147_v41, -inf }
  0x8c   : > { %1423 = vmatprep.subr.mxu1 %v1793_v0  ;;  %1404 = vmatprep.subr.mxu0 %v1793_v0  ;;  %v480_v34 = vmax.f32 %v478_v22, %v479_v27  ;;  %v943_v52 = vmax.f32 %v941_v46, %v942_v47  ;;  %vm704_vm4 = vcmask 8192  }
  0x8d   : > { %1424 = vmatpush3.msra.mxu1 %v1794_v1  ;;  %1405 = vmatpush3.msra.mxu0 %v1794_v1  ;;  %v343_v36 = vrot.slane %v342_v29, 2  ;;  %v387_v37 = vrot.slane %v386_v30, 2  ;;  %v713_v39 = vrot.slane %v712_v35, 4 }
  0x8e   : > { %1425 = vmatprep.subr.mxu1 %v1793_v0  ;;  %1406 = vmatprep.subr.mxu0 %v1793_v0  ;;  %v481_v38 = vrot.slane %v480_v34, 2  ;;  %v944_v57 = vrot.slane %v943_v52, 4 }
  0x8f   : > { %1426 = vmatpush3.msra.mxu1 %v1794_v1  ;;  %1407 = vmatpush3.msra.mxu0 %v1794_v1  ;;  %v344_v42 = vmax.f32 %v342_v29, %v343_v36  ;;  %v388_v43 = vadd.f32 %v387_v37, %v386_v30  ;;  %v714_v45 = vmax.f32 %v712_v35, %v713_v39 }
  0x90   : > { %1427 = vmatprep.subr.mxu1 %v1793_v0  ;;  %1408 = vmatprep.subr.mxu0 %v1793_v0  ;;  %v482_v44 = vmax.f32 %v480_v34, %v481_v38  ;;  %v945_v63 = vmax.f32 %v943_v52, %v944_v57  ;;  %v516_v52 = vmul.f32 %v2078_v9, %v2078_v9 }
  0x91   : > { %1428 = vmatpush3.msra.mxu1 %v1794_v1  ;;  %1409 = vmatpush3.msra.mxu0 %v1794_v1  ;;  %v345_v48 = vrot.slane %v344_v42, 1  ;;  %v389_v49 = vrot.slane %v388_v43, 1  ;;  %v715_v51 = vrot.slane %v714_v45, 2 }
  0x92   : > { %1429 = vmatprep.subr.mxu1 %v1793_v0  ;;  %1410 = vmatprep.subr.mxu0 %v1793_v0  ;;  %v483_v50 = vrot.slane %v482_v44, 1  ;;  %v946_v13 = vrot.slane %v945_v63, 2 }
  0x93   : > { %1430 = vmatpush3.msra.mxu1 %v1794_v1  ;;  %1411 = vmatpush3.msra.mxu0 %v1794_v1  ;;  %v346_v53 = vmax.f32 %v344_v42, %v345_v48  ;;  %v390_v54 = vadd.f32 %v389_v49, %v388_v43  ;;  %v716_v56 = vmax.f32 %v714_v45, %v715_v51 }
  0x94   : > { %1412 = vmatprep.mubr.msk.f32.mxu0 %vm1795_vm1, %v1793_v0  ;;  %1431 = vmatprep.mubr.msk.f32.mxu1 %vm1795_vm1, %v1793_v0  ;;  %v484_v55 = vmax.f32 %v482_v44, %v483_v50  ;;  %v947_v16 = vmax.f32 %v945_v63, %v946_v13  ;;  %v515_v51 = vmul.f32 %v2062_v4, %v2062_v4 }
  0x95   : > { %1453 = vmatprep.subr.mxu1 %v1793_v0  ;;  %1434 = vmatprep.subr.mxu0 %v1793_v0  ;;  %v2155_v58 = vsub.f32 %v2067_v5, %v346_v53  ;;  %v2158_v59 = vsub.f32 %v2070_v6, %v346_v53  ;;  %v717_v62 = vrot.slane %v716_v56, 1 }
  0x96   : > { %1413 = vmatmul.mubr.msk.f32.vlgmr.msra.gmra.mxu0 %vm337_vm0, %v390_v54  ;;  %v2162_v60 = vsub.f32 %v2083_v10, %v484_v55  ;;  %v2165_v61 = vsub.f32 %v2086_v11, %v484_v55  ;;  %v948_v19 = vrot.slane %v947_v16, 1  ;;  %v517_v55 = vsel %vm337_vm0, %v515_v51, 0.0 }
  0x97   : > { %1435 = vmatpush3.msra.mxu0 %v1794_v1  ;;  %1450 = vmatprep.mubr.msk.f32.mxu0 %vm1795_vm1, %v1793_v0  ;;  %v349_v5 = vmul.f32 1.442695, %v2155_v58  ;;  %v351_v6 = vmul.f32 1.442695, %v2158_v59  ;;  %v718_v10 = vmax.f32 %v716_v56, %v717_v62  ;;  %v518_v56 = vsel %vm337_vm0, %v516_v52, 0.0 }
  0x98   : > { %1436 = vmatprep.subr.mxu0 %v1793_v0  ;;  %v487_v7 = vmul.f32 1.442695, %v2162_v60  ;;  %v489_v8 = vmul.f32 1.442695, %v2165_v61  ;;  %v949_v21 = vmax.f32 %v947_v16, %v948_v19 }
  0x99   : > { %1437 = vmatpush3.msra.mxu0 %v1794_v1  ;;  %1597 = vpow2.f32 %v349_v5  ;;  %v2178_v11 = vsub.f32 %v2113_v23, %v718_v10  ;;  %v2182_v14 = vsub.f32 %v2118_v26, %v718_v10 }
  0x9a   : > { %1438 = vmatprep.subr.mxu0 %v1793_v0  ;;  %1599 = vpow2.f32 %v351_v6  ;;  %v2202_v30 = vsub.f32 %v2144_v40, %v949_v21  ;;  %v2205_v34 = vsub.f32 %v2147_v41, %v949_v21  ;;  %v519_v6 = vadd.f32 %v518_v56, %v517_v55 }
  0x9b   : > { %1439 = vmatpush3.msra.mxu0 %v1794_v1  ;;  %1601 = vpow2.f32 %v487_v7  ;;  %v721_v15 = vmul.f32 1.442695, %v2178_v11  ;;  %v723_v18 = vmul.f32 1.442695, %v2182_v14 }
  0x9c   : > { %1440 = vmatprep.subr.mxu0 %v1793_v0  ;;  %1603 = vpow2.f32 %v489_v8  ;;  %v952_v37 = vmul.f32 1.442695, %v2202_v30  ;;  %v954_v42 = vmul.f32 1.442695, %v2205_v34  ;;  %v520_v16 = vrot.slane %v519_v6, 4 }
  0x9d   : > { %1441 = vmatpush3.msra.mxu0 %v1794_v1  ;;  %1605 = vpow2.f32 %v721_v15 }
  0x9e   : > { %1442 = vmatprep.subr.mxu0 %v1793_v0  ;;  %1607 = vpow2.f32 %v723_v18 }
  0x9f   : > { %1443 = vmatpush3.msra.mxu0 %v1794_v1  ;;  %1609 = vpow2.f32 %v952_v37 }
  0xa0   : > { %1444 = vmatprep.subr.mxu0 %v1793_v0  ;;  %1611 = vpow2.f32 %v954_v42 }
  0xa1   : > { %1445 = vmatpush3.msra.mxu0 %v1794_v1 }
  0xa2   : > { %1446 = vmatprep.subr.mxu0 %v1793_v0 }
  0xa3   : > { %1447 = vmatpush3.msra.mxu0 %v1794_v1 }
  0xa4   : > { %1448 = vmatprep.subr.mxu0 %v1793_v0 }
  0xa5   : > { %1449 = vmatpush3.msra.mxu0 %v1794_v1 }
  0xa6   : > { %1472 = vmatprep.subr.mxu0 %v1793_v0  ;;  %v1598_v20 = vpop.eup %1597 }
  0xa7   : > { %v1600_v22 = vpop.eup %1599  ;;  %v353_v23 = vsel %vm337_vm0, %v1598_v20, 0.0 }
  0xa8   : > { %v1602_v24 = vpop.eup %1601  ;;  %v354_v25 = vsel %vm337_vm0, %v1600_v22, 0.0 }
  0xa9   : > { %v1604_v26 = vpop.eup %1603  ;;  %v355_v27 = vadd.f32 %v354_v25, %v353_v23  ;;  %v491_v28 = vsel %vm337_vm0, %v1602_v24, 0.0  ;;  %v749_v23 = vmul.f32 %v2090_v12, %v2090_v12  ;;  %v750_v24 = vmul.f32 %v2102_v17, %v2102_v17 }
  0xaa   : > { %v492_v29 = vsel %vm337_vm0, %v1604_v26, 0.0  ;;  %v1606_v38 = vpop.eup %1605 }
  0xab   : > { %v356_v31 = vrot.slane %v355_v27, 4  ;;  %v493_v35 = vadd.f32 %v492_v29, %v491_v28  ;;  %v1608_v43 = vpop.eup %1607  ;;  %v725_v40 = vsel %vm337_vm0, %v1606_v38, 0.0 }
  0xac   : > { %v726_v47 = vsel %vm337_vm0, %v1608_v43, 0.0  ;;  %v1610_v62 = vpop.eup %1609 }
  0xad   : > { %v357_v36 = vadd.f32 %v356_v31, %v355_v27  ;;  %v494_v44 = vrot.slane %v493_v35, 4  ;;  %v727_v49 = vadd.f32 %v726_v47, %v725_v40  ;;  %v1612_v63 = vpop.eup %1611  ;;  %v956_v8 = vsel %vm337_vm0, %v1610_v62, 0.0 }
  0xae   : > { %v957_v10 = vsel %vm337_vm0, %v1612_v63, 0.0  ;;  %v521_v31 = vadd.f32 %v520_v16, %v519_v6 }
  0xaf   : > { %v358_v39 = vrot.slane %v357_v36, 2  ;;  %v495_v41 = vadd.f32 %v494_v44, %v493_v35  ;;  %v728_v53 = vrot.slane %v727_v49, 4  ;;  %v958_v25 = vadd.f32 %v957_v10, %v956_v8 }
  0xb1   : > { %v359_v45 = vadd.f32 %v358_v39, %v357_v36  ;;  %v496_v50 = vrot.slane %v495_v41, 2  ;;  %v729_v57 = vadd.f32 %v728_v53, %v727_v49  ;;  %v959_v43 = vrot.slane %v958_v25, 4 }
  0xb3   : > { %v360_v46 = vrot.slane %v359_v45, 1  ;;  %v497_v54 = vadd.f32 %v496_v50, %v495_v41  ;;  %v730_v7 = vrot.slane %v729_v57, 2  ;;  %v522_v41 = vrot.slane %v521_v31, 2 }
  0xb4   : > { %v960_v50 = vadd.f32 %v959_v43, %v958_v25  ;;  %v981_v25 = vmul.f32 %v2134_v33, %v2134_v33 }
  0xb5   : > { %v361_v48 = vadd.f32 %v360_v46, %v359_v45  ;;  %v498_v5 = vrot.slane %v497_v54, 1  ;;  %v731_v21 = vadd.f32 %v730_v7, %v729_v57  ;;  %v752_v45 = vsel %vm337_vm0, %v750_v24, 0.0 }
  0xb6   : > { %v523_v63 = vadd.f32 %v522_v41, %v521_v31  ;;  %v961_v6 = vrot.slane %v960_v50, 2 }
  0xb7   : > { %1613 = vrcp.f32 %v361_v48  ;;  %v499_v15 = vadd.f32 %v498_v5, %v497_v54  ;;  %v732_v39 = vrot.slane %v731_v21, 1 }
  0xb8   : > { %1615 = vlog2.f32 %v361_v48 }
  0xb9   : > { %1617 = vlog2.f32 %v499_v15  ;;  %v733_v48 = vadd.f32 %v732_v39, %v731_v21 }
  0xbb   : > { %1619 = vlog2.f32 %v733_v48 }
  0xc4   : > { %v1614_v13 = vpop.eup %1613 }
  0xc5   : > { %v364_v18 = vmul.f32 %v1614_v13, %v1598_v20  ;;  %v365_v19 = vmul.f32 %v1614_v13, %v1600_v22  ;;  %v1616_v54 = vpop.eup %1615 }
  0xc6   : > { %v378_v8 = vmul.f32 0.6931472, %v1616_v54  ;;  %v1618_v15 = vpop.eup %1617 }
  0xc7   : > { %v366_v26 = vmul.f32 %v364_v18, %v2155_v58  ;;  %v367_v27 = vmul.f32 %v365_v19, %v2158_v59  ;;  %v500_v28 = vmul.f32 %v2162_v60, %v364_v18  ;;  %v501_v29 = vmul.f32 %v2165_v61, %v365_v19 }
  0xc8   : > { %v734_v20 = vmul.f32 %v2178_v11, %v364_v18  ;;  %v735_v22 = vmul.f32 %v2182_v14, %v365_v19  ;;  %v751_v14 = vsel %vm337_vm0, %v749_v23, 0.0  ;;  %v965_v55 = vmul.f32 %v2202_v30, %v364_v18 }
  0xc9   : > { %v368_v35 = vsel %vm337_vm0, %v366_v26, 0.0  ;;  %v369_v36 = vsel %vm337_vm0, %v367_v27, 0.0  ;;  %v502_v37 = vsel %vm337_vm0, %v500_v28, 0.0  ;;  %v503_v58 = vsel %vm337_vm0, %v501_v29, 0.0 }
  0xca   : > { %v370_v38 = vadd.f32 %v369_v36, %v368_v35  ;;  %v504_v59 = vadd.f32 %v503_v58, %v502_v37  ;;  %v736_v60 = vsel %vm337_vm0, %v734_v20, 0.0  ;;  %v737_v61 = vsel %vm337_vm0, %v735_v22, 0.0 }
  0xcb   : > { %v738_v42 = vadd.f32 %v737_v61, %v736_v60  ;;  %v753_v49 = vadd.f32 %v752_v45, %v751_v14  ;;  %v966_v56 = vmul.f32 %v2205_v34, %v365_v19  ;;  %v967_v16 = vsel %vm337_vm0, %v965_v55, 0.0 }
  0xcc   : > { %v371_v11 = vrot.slane %v370_v38, 4  ;;  %v505_v44 = vrot.slane %v504_v59, 4  ;;  %v524_v30 = vrot.slane %v523_v63, 1  ;;  %v962_v34 = vadd.f32 %v961_v6, %v960_v50 }
  0xcd   : > { %v739_v46 = vrot.slane %v738_v42, 4  ;;  %v754_v5 = vrot.slane %v753_v49, 4  ;;  %v968_v21 = vsel %vm337_vm0, %v966_v56, 0.0  ;;  %v980_v19 = vmul.f32 %v2130_v32, %v2130_v32 }
  0xce   : > { %v372_v40 = vadd.f32 %v371_v11, %v370_v38  ;;  %v506_v47 = vadd.f32 %v505_v44, %v504_v59  ;;  %v513_v27 = vmul.f32 0.6931472, %v1618_v15  ;;  %v969_v29 = vadd.f32 %v968_v21, %v967_v16 }
  0xcf   : > { %v740_v53 = vadd.f32 %v739_v46, %v738_v42  ;;  %v755_v18 = vadd.f32 %v754_v5, %v753_v49  ;;  %v525_v20 = vadd.f32 %v524_v30, %v523_v63  ;;  %v982_v35 = vsel %vm337_vm0, %v980_v19, 0.0  ;;  %v1620_v42 = vpop.eup %1619 }
  0xd0   : > { %v373_v51 = vrot.slane %v372_v40, 2  ;;  %v507_v52 = vrot.slane %v506_v47, 2  ;;  %v983_v36 = vsel %vm337_vm0, %v981_v25, 0.0  ;;  %v963_v38 = vrot.slane %v962_v34, 1 }
  0xd1   : > { %v741_v13 = vrot.slane %v740_v53, 2  ;;  %v756_v22 = vrot.slane %v755_v18, 2  ;;  %v970_v59 = vrot.slane %v969_v29, 4  ;;  %v984_v39 = vadd.f32 %v983_v36, %v982_v35 }
  0xd2   : > { %v374_v57 = vadd.f32 %v373_v51, %v372_v40  ;;  %v508_v62 = vadd.f32 %v507_v52, %v506_v47  ;;  %v964_v11 = vadd.f32 %v963_v38, %v962_v34  ;;  %v747_v40 = vmul.f32 0.6931472, %v1620_v42 }
  0xd3   : > { %v742_v28 = vadd.f32 %v741_v13, %v740_v53  ;;  %v757_v61 = vadd.f32 %v756_v22, %v755_v18  ;;  %v971_v44 = vadd.f32 %v970_v59, %v969_v29  ;;  %v985_v45 = vrot.slane %v984_v39, 4 }
  0xd4   : > { %v375_v7 = vrot.slane %v374_v57, 1  ;;  %v509_v10 = vrot.slane %v508_v62, 1  ;;  %1621 = vlog2.f32 %v964_v11 }
  0xd5   : > { %v743_v58 = vrot.slane %v742_v28, 1  ;;  %v758_v14 = vrot.slane %v757_v61, 1  ;;  %v972_v47 = vrot.slane %v971_v44, 2  ;;  %v986_v50 = vadd.f32 %v985_v45, %v984_v39 }
  0xd6   : > { %v376_v23 = vadd.f32 %v375_v7, %v374_v57  ;;  %v510_v24 = vadd.f32 %v509_v10, %v508_v62 }
  0xd7   : > { %v744_v43 = vadd.f32 %v743_v58, %v742_v28  ;;  %v759_v48 = vadd.f32 %v758_v14, %v757_v61  ;;  %v973_v49 = vadd.f32 %v972_v47, %v971_v44  ;;  %v987_v53 = vrot.slane %v986_v50, 2 }
  0xd8   : > { %v2245_v26 = vsub.f32 %v376_v23, %v378_v8 }
  0xd9   : > { %v974_v52 = vrot.slane %v973_v49, 1  ;;  %v988_v55 = vadd.f32 %v987_v53, %v986_v50 }
  0xda   : > { %v511_v31 = vsub.f32 %v2245_v26, %v510_v24  ;;  %v745_v46 = vsub.f32 %v2245_v26, %v744_v43 }
  0xdb   : > { %v975_v54 = vadd.f32 %v974_v52, %v973_v49  ;;  %v989_v63 = vrot.slane %v988_v55, 1 }
  0xdc   : > { %v514_v37 = vadd.f32 %v513_v27, %v511_v31  ;;  %v748_v41 = vadd.f32 %v747_v40, %v745_v46 }
  0xdd   : > { %v976_v57 = vsub.f32 %v2245_v26, %v975_v54  ;;  %v990_v6 = vadd.f32 %v989_v63, %v988_v55 }
  0xde   : > { %v527_v60 = vsel %vm526_vm2, %v514_v37, %v525_v20  ;;  %v760_v51 = vsel %vm526_vm2, %v748_v41, %v759_v48 }
  0xdf   : > { %1432 = vmatmul.mubr.msk.f32.vlgmr.msra.gmra.mxu1 %vm337_vm0, %v527_v60 }
  0xe0   : > { %1454 = vmatpush3.msra.mxu1 %v1794_v1  ;;  %1469 = vmatprep.mubr.msk.f32.mxu1 %vm1795_vm1, %v1793_v0 }
  0xe1   : > { %1455 = vmatprep.subr.mxu1 %v1793_v0  ;;  %v1622_v56 = vpop.eup %1621 }
  0xe2   : > { %1456 = vmatpush3.msra.mxu1 %v1794_v1  ;;  %v978_v62 = vmul.f32 0.6931472, %v1622_v56 }
  0xe3   : > { %1457 = vmatprep.subr.mxu1 %v1793_v0 }
  0xe4   : > { %1458 = vmatpush3.msra.mxu1 %v1794_v1  ;;  %v979_v5 = vadd.f32 %v978_v62, %v976_v57 }
  0xe5   : > { %1459 = vmatprep.subr.mxu1 %v1793_v0 }
  0xe6   : > { %1460 = vmatpush3.msra.mxu1 %v1794_v1  ;;  %v991_v7 = vsel %vm526_vm2, %v979_v5, %v990_v6 }
  0xe7   : > { %1461 = vmatprep.subr.mxu1 %v1793_v0 }
  0xe8   : > { %1462 = vmatpush3.msra.mxu1 %v1794_v1 }
  0xe9   : > { %1463 = vmatprep.subr.mxu1 %v1793_v0 }
  0xea   : > { %1464 = vmatpush3.msra.mxu1 %v1794_v1 }
  0xeb   : > { %1465 = vmatprep.subr.mxu1 %v1793_v0 }
  0xec   : > { %1466 = vmatpush3.msra.mxu1 %v1794_v1 }
  0xed   : > { %1467 = vmatprep.subr.mxu1 %v1793_v0 }
  0xee   : > { %1468 = vmatpush3.msra.mxu1 %v1794_v1 }
  0xef   : > { %1470 = vmatmul.mubr.msk.f32.vlgmr.msra.gmra.mxu1 %vm337_vm0, %v760_v51  ;;  %1491 = vmatprep.subr.mxu1 %v1793_v0 }
  0xf0   : > { %1492 = vmatpush3.msra.mxu1 %v1794_v1  ;;  %1507 = vmatprep.mubr.msk.f32.mxu1 %vm1795_vm1, %v1793_v0 }
  0xf1   : > { %1493 = vmatprep.subr.mxu1 %v1793_v0 }
  0xf2   : > { %1494 = vmatpush3.msra.mxu1 %v1794_v1 }
  0xf3   : > { %1495 = vmatprep.subr.mxu1 %v1793_v0 }
  0xf4   : > { %1496 = vmatpush3.msra.mxu1 %v1794_v1 }
  0xf5   : > { %1497 = vmatprep.subr.mxu1 %v1793_v0 }
  0xf6   : > { %1498 = vmatpush3.msra.mxu1 %v1794_v1 }
  0xf7   : > { %1499 = vmatprep.subr.mxu1 %v1793_v0 }
  0xf8   : > { %1500 = vmatpush3.msra.mxu1 %v1794_v1 }
  0xf9   : > { %1501 = vmatprep.subr.mxu1 %v1793_v0 }
  0xfa   : > { %1502 = vmatpush3.msra.mxu1 %v1794_v1 }
  0xfb   : > { %1503 = vmatprep.subr.mxu1 %v1793_v0 }
  0xfc   : > { %1504 = vmatpush3.msra.mxu1 %v1794_v1 }
  0xfd   : > { %1505 = vmatprep.subr.mxu1 %v1793_v0 }
  0xfe   : > { %1506 = vmatpush3.msra.mxu1 %v1794_v1 }
  0xff   : > { %1508 = vmatmul.mubr.msk.f32.vlgmr.msra.gmra.mxu1 %vm337_vm0, %v991_v7 }
 0x156   : > { %v460_v8 = vpop.f32.mrf.mxu0 }
 0x157   : > { %v464_v10 = vmax.f32 %v460_v8, 1e-24 }
 0x158   : > { %v1414_v13 = vpop.f32.mrf.mxu0 }
 0x159   : > { %1623 = vrsqrt.f32 %v464_v10 }
 0x166   : > { %v1624_v15 = vpop.eup %1623 }
 0x167   : > { %1529 = vpush %v1624_v15 }
 0x198   : > { %s1530_s24 = spop %1529 }
 0x199   : > { %v468_v22 = vstv %s1530_s24 }
 0x19a   : > { %v470_v35 = vmul.f32 %v468_v22, %v2056_v2  ;;  %v471_v36 = vmul.f32 %v468_v22, %v2058_v3 }
 0x19f   : > { %v2293_v16 = vpop.f32.mrf.mxu1 }
 0x1a0   : > { %v602_v21 = vmax.f32 %v2293_v16, 1e-24 }
 0x1a1   : > { %v1433_v23 = vpop.f32.mrf.mxu1 }
 0x1a2   : > { %1625 = vrsqrt.f32 %v602_v21 }
 0x1af   : > { %v1626_v24 = vpop.eup %1625  ;;  %v2296_v30 = vpop.f32.mrf.mxu1 }
 0x1b0   : > { %v835_v18 = vmax.f32 %v2296_v30, 1e-24  ;;  %v605_v34 = vrot.slane %v1626_v24, 1 }
 0x1b1   : > { %v1471_v19 = vpop.f32.mrf.mxu1 }
 0x1b2   : > { %1627 = vrsqrt.f32 %v835_v18  ;;  %1531 = vpush %v605_v34 }
 0x1bf   : > { %v1628_v25 = vpop.eup %1627  ;;  %v2299_v26 = vpop.f32.mrf.mxu1 }
 0x1c0   : > { %v1066_v27 = vmax.f32 %v2299_v26, 1e-24  ;;  %v838_v28 = vrot.slane %v1628_v25, 1 }
 0x1c1   : > { %v1509_v29 = vpop.f32.mrf.mxu1 }
 0x1c2   : > { %1629 = vrsqrt.f32 %v1066_v27  ;;  %1533 = vpush %v838_v28 }
 0x1cf   : > { %v1630_v31 = vpop.eup %1629 }
 0x1d0   : > { %v1069_v20 = vrot.slane %v1630_v31, 1 }
 0x1d2   : > { %1535 = vpush %v1069_v20 }
 0x1e3   : > { %s1532_s5 = spop %1531 }
 0x1e4   : > { %v607_v37 = vstv %s1532_s5 }
 0x1e5   : > { %v609_v58 = vmul.f32 %v607_v37, %v2062_v4  ;;  %v610_v38 = vmul.f32 %v607_v37, %v2078_v9 }
 0x1e7   : > { %v611_v59 = vsub.f32 %v609_v58, %v470_v35  ;;  %v612_v60 = vsub.f32 %v610_v38, %v471_v36  ;;  %v1065_v38 = vmul.f32 0.015625, %v2299_v26 }
 0x1e9   : > { %v613_v61 = vand.u32 2147483647, %v611_v59  ;;  %v614_v39 = vand.u32 2147483647, %v612_v60 }
 0x1eb   : > { %v615_v42 = vsel %vm337_vm0, %v613_v61, 0.0  ;;  %v616_v43 = vsel %vm337_vm0, %v614_v39, 0.0 }
 0x1ec   : > { %v617_v11 = vadd.f32 %v616_v43, %v615_v42 }
 0x1ee   : > { %v618_v44 = vrot.slane %v617_v11, 4 }
 0x1f0   : > { %v619_v14 = vadd.f32 %v618_v44, %v617_v11 }
 0x1f2   : > { %v620_v2 = vrot.slane %v619_v14, 2 }
 0x1f3   : > { %s1534_s15 = spop %1533 }
 0x1f4   : > { %v621_v3 = vadd.f32 %v620_v2, %v619_v14  ;;  %v840_v45 = vstv %s1534_s15 }
 0x1f5   : > { %v842_v46 = vmul.f32 %v840_v45, %v2090_v12  ;;  %v843_v4 = vmul.f32 %v840_v45, %v2102_v17 }
 0x1f6   : > { %v622_v9 = vrot.slane %v621_v3, 1 }
 0x1f7   : > { %v844_v40 = vsub.f32 %v842_v46, %v470_v35  ;;  %v845_v47 = vsub.f32 %v843_v4, %v471_v36 }
 0x1f8   : > { %v623_v41 = vadd.f32 %v622_v9, %v621_v3 }
 0x1f9   : > { %v846_v48 = vand.u32 2147483647, %v844_v40  ;;  %v847_v49 = vand.u32 2147483647, %v845_v47 }
 0x1fa   : > { %1451 = vmatmul.mubr.msk.f32.vlgmr.msra.gmra.mxu0 %vm337_vm0, %v623_v41 }
 0x1fb   : > { %v848_v50 = vsel %vm337_vm0, %v846_v48, 0.0  ;;  %v849_v51 = vsel %vm337_vm0, %v847_v49, 0.0  ;;  %1473 = vmatpush3.msra.mxu0 %v1794_v1  ;;  %1488 = vmatprep.mubr.msk.f32.mxu0 %vm1795_vm1, %v1793_v0 }
 0x1fc   : > { %v850_v12 = vadd.f32 %v849_v51, %v848_v50  ;;  %1474 = vmatprep.subr.mxu0 %v1793_v0 }
 0x1fd   : > { %1475 = vmatpush3.msra.mxu0 %v1794_v1 }
 0x1fe   : > { %v851_v17 = vrot.slane %v850_v12, 4  ;;  %1476 = vmatprep.subr.mxu0 %v1793_v0 }
 0x1ff   : > { %1477 = vmatpush3.msra.mxu0 %v1794_v1 }
 0x200   : > { %v852_v52 = vadd.f32 %v851_v17, %v850_v12  ;;  %1478 = vmatprep.subr.mxu0 %v1793_v0 }
 0x201   : > { %1479 = vmatpush3.msra.mxu0 %v1794_v1 }
 0x202   : > { %v853_v53 = vrot.slane %v852_v52, 2  ;;  %1480 = vmatprep.subr.mxu0 %v1793_v0 }
 0x203   : > { %1481 = vmatpush3.msra.mxu0 %v1794_v1  ;;  %s1536_s22 = spop %1535 }
 0x204   : > { %v854_v54 = vadd.f32 %v853_v53, %v852_v52  ;;  %v1071_v55 = vstv %s1536_s22  ;;  %1482 = vmatprep.subr.mxu0 %v1793_v0 }
 0x205   : > { %v1073_v56 = vmul.f32 %v1071_v55, %v2130_v32  ;;  %v1074_v57 = vmul.f32 %v1071_v55, %v2134_v33  ;;  %1483 = vmatpush3.msra.mxu0 %v1794_v1 }
 0x206   : > { %v855_v62 = vrot.slane %v854_v54, 1  ;;  %1484 = vmatprep.subr.mxu0 %v1793_v0 }
 0x207   : > { %v1075_v63 = vsub.f32 %v1073_v56, %v470_v35  ;;  %v1076_v5 = vsub.f32 %v1074_v57, %v471_v36  ;;  %1485 = vmatpush3.msra.mxu0 %v1794_v1  ;;  %v834_v36 = vmul.f32 0.015625, %v2296_v30 }
 0x208   : > { %1486 = vmatprep.subr.mxu0 %v1793_v0  ;;  %v856_v6 = vadd.f32 %v855_v62, %v854_v54 }
 0x209   : > { %v1077_v7 = vand.u32 2147483647, %v1075_v63  ;;  %v1078_v8 = vand.u32 2147483647, %v1076_v5  ;;  %1487 = vmatpush3.msra.mxu0 %v1794_v1 }
 0x20a   : > { %1489 = vmatmul.mubr.msk.f32.vlgmr.msra.gmra.mxu0 %vm337_vm0, %v856_v6  ;;  %1510 = vmatprep.subr.mxu0 %v1793_v0 }
 0x20b   : > { %v1079_v32 = vsel %vm337_vm0, %v1077_v7, 0.0  ;;  %v1080_v33 = vsel %vm337_vm0, %v1078_v8, 0.0  ;;  %1511 = vmatpush3.msra.mxu0 %v1794_v1  ;;  %1526 = vmatprep.mubr.msk.f32.mxu0 %vm1795_vm1, %v1793_v0 }
 0x20c   : > { %v1081_v10 = vadd.f32 %v1080_v33, %v1079_v32  ;;  %1512 = vmatprep.subr.mxu0 %v1793_v0 }
 0x20d   : > { %1513 = vmatpush3.msra.mxu0 %v1794_v1 }
 0x20e   : > { %v1082_v13 = vrot.slane %v1081_v10, 4  ;;  %1514 = vmatprep.subr.mxu0 %v1793_v0 }
 0x20f   : > { %1515 = vmatpush3.msra.mxu0 %v1794_v1 }
 0x210   : > { %v1083_v15 = vadd.f32 %v1082_v13, %v1081_v10  ;;  %1516 = vmatprep.subr.mxu0 %v1793_v0 }
 0x211   : > { %1517 = vmatpush3.msra.mxu0 %v1794_v1 }
 0x212   : > { %v1084_v21 = vrot.slane %v1083_v15, 2  ;;  %1518 = vmatprep.subr.mxu0 %v1793_v0 }
 0x213   : > { %1519 = vmatpush3.msra.mxu0 %v1794_v1 }
 0x214   : > { %v1085_v23 = vadd.f32 %v1084_v21, %v1083_v15  ;;  %1520 = vmatprep.subr.mxu0 %v1793_v0 }
 0x215   : > { %1521 = vmatpush3.msra.mxu0 %v1794_v1 }
 0x216   : > { %v1086_v24 = vrot.slane %v1085_v23, 1  ;;  %1522 = vmatprep.subr.mxu0 %v1793_v0 }
 0x217   : > { %1523 = vmatpush3.msra.mxu0 %v1794_v1 }
 0x218   : > { %1524 = vmatprep.subr.mxu0 %v1793_v0  ;;  %v1087_v18 = vadd.f32 %v1086_v24, %v1085_v23  ;;  %v601_v0 = vmul.f32 0.015625, %v2293_v16 }
 0x219   : > { %1525 = vmatpush3.msra.mxu0 %v1794_v1 }
 0x21a   : > { %1527 = vmatmul.mubr.msk.f32.vlgmr.msra.gmra.mxu0 %vm337_vm0, %v1087_v18 }
 0x2ba   : > { %v693_v34 = vpop.f32.mrf.mxu0 }
 0x2bb   : > { %v697_v19 = vmul.f32 0.0009765625, %v693_v34 }
 0x2bc   : > { %v1452_v25 = vpop.f32.mrf.mxu0 }
 0x2bd   : > { %699 = vrot.lane.b32.xlu0 %v697_v19, %s1796_s9 }
 0x2ca   : > { %v926_v27 = vpop.f32.mrf.mxu0 }
 0x2cb   : > { %v930_v28 = vmul.f32 0.0009765625, %v926_v27 }
 0x2cc   : > { %v1490_v29 = vpop.f32.mrf.mxu0 }
 0x2cd   : > { %932 = vrot.lane.b32.xlu0 %v930_v28, %s1796_s9 }
 0x2da   : > { %v1157_v31 = vpop.f32.mrf.mxu0 }
 0x2db   : > { %v1161_v20 = vmul.f32 0.0009765625, %v1157_v31 }
 0x2dc   : > { %v1528_v22 = vpop.f32.mrf.mxu0 }
 0x2dd   : > { %1163 = vrot.lane.b32.xlu1 %v1161_v20, %s1796_s9 }
 0x32f   : > { %v700_v1 = vpop.permute.xlu0 %699 }
 0x330   : > { %v703_v35 = vsel %vm702_vm3, %v601_v0, %v700_v1 }
 0x331   : > { %705 = vst.msk [vmem:[%s332_s25] sm:$0x1] %vm704_vm4, %v703_v35 }
 0x33f   : > { %v933_v37 = vpop.permute.xlu0 %932 }
 0x340   : > { %v935_v58 = vsel %vm702_vm3, %v834_v36, %v933_v37 }
 0x341   : > { %936 = vst.msk [vmem:[%s332_s25 + $0x1] sm:$0x1] %vm704_vm4, %v935_v58 }
 0x34f   : > { %v1164_v59 = vpop.permute.xlu1 %1163 }
 0x350   : > { %v1166_v60 = vsel %vm702_vm3, %v1065_v38, %v1164_v59 }
 0x351   : > { %1167 = vst.msk [vmem:[%s332_s25 + $0x2] sm:$0x1] %vm704_vm4, %v1166_v60 }
 0x352 PF: > { %p20_p6 = scmp.ge.s32.totalorder %s1844_s20, 4   ;;  %s2397_s15 = smov %s1777_s16 }
 0x353   : > { %s2398_s16 = smov %s1781_s17  ;;  %s2399_s17 = smov %s1854_s23 }
 0x354   : > { %s2400_s18 = smov %s1844_s20  ;;  %22 = sbr.rel (!%p20_p6) target bundleno = 9 (0x9), region = 113 }
 0x359   :  { %1187 = vsyncpa [#allocation3], 1 }
 0x35a   :  { %1189 = vsyncpa [#allocation3 + $0x1], 1 }
 0x35b   :  { %1190 = vsyncpa [#allocation5], 1 }
 0x35c   :  { %1192 = vsyncpa [#allocation5 + $0x1], 1 }
 0x35d   :  { %1193 = vsyncpa [#allocation8], 1 }
 0x35e   :  { %1195 = vsyncpa [#allocation8 + $0x1], 1 }

</bundles_post_ra>
